<compile_context>
chip_gen: v7x
topology: tpu7x:2x2x1
jax: 0.10.0
libtpu: 0.0.40
codegen_flags: <defaults>
</compile_context>

<pallas_src>
import numpy as np
import jax
import jax.numpy as jnp
from jax.experimental import pallas as pl
from jax.experimental.pallas import tpu as pltpu


CONFIG = dict(
    num_mods=6,
    num_preds=16,
    cls_th=2.0,
    cls_ignore=0.2,
    mgn=0.2,
    goal_cls_coef=1.0,
    goal_reg_coef=1.0,
    mid_goal_reg_coef=0.5,
)

LANE = 128
SUB_S = 8  # sublanes per inner tile -> each (SUB_S, LANE) f32 plane is one vreg


def _round_up(x, m):
    return ((x + m - 1) // m) * m


def _cdiv(a, b):
    return (a + b - 1) // b


def _smooth_l1(d):
    # nn.SmoothL1Loss with beta=1.0, element-wise (reduction handled outside).
    ad = jnp.abs(d)
    return jnp.where(ad < 1.0, 0.5 * d * d, ad - 0.5)


def _make_kernel(cfg, M, block_s):
    cls_th = float(cfg["cls_th"])
    cls_ignore = float(cfg["cls_ignore"])
    mgn_th = float(cfg["mgn"])
    n_sub = block_s // SUB_S

    # Plane indices inside the packed slab.
    LPX, LPY = 3 * M, 3 * M + 1
    LMX, LMY = 3 * M + 2, 3 * M + 3
    MGX, MGY = 3 * M + 4, 3 * M + 5
    ROW, MID = 3 * M + 6, 3 * M + 7

    def kernel(packed_ref, o_ref):
        # packed_ref: (F, block_s, LANE) f32 VMEM
        # o_ref:      (1, 6, SUB_S, LANE) f32 VMEM — block index is constant
        #             along the inner "arbitrary" axis, so it stays resident
        #             and acts as the accumulator; written back once per core.
        @pl.when(pl.program_id(1) == 0)
        def _init():
            o_ref[...] = jnp.zeros_like(o_ref)

        def sub_body(c, carry):
            cls_l, cls_n, reg_l, reg_n, mid_l, mid_n = carry
            sl = pl.ds(pl.multiple_of(c * SUB_S, SUB_S), SUB_S)

            def plane(f):
                return packed_ref[f, sl, :]            # dense (SUB_S, LANE) f32

            row_m = plane(ROW)
            mid_m = plane(MID)
            lpx = plane(LPX)
            lpy = plane(LPY)

            # ---------------- mid goal regression ----------------
            lmx = plane(LMX)
            lmy = plane(LMY)
            mgx = plane(MGX)
            mgy = plane(MGY)
            mid_l = mid_l + mid_m * (_smooth_l1(mgx - lmx) + _smooth_l1(mgy - lmy))
            mid_n = mid_n + mid_m

            # ----- per-mode endpoint distance, first-argmin selection -----
            dists = []
            clss = []
            min_d = sel_cls = sel_gx = sel_gy = None
            for m in range(M):
                gx = plane(M + m)
                gy = plane(2 * M + m)
                cm = plane(m)
                dx = gx - lpx
                dy = gy - lpy
                dm = jnp.sqrt(dx * dx + dy * dy)
                dists.append(dm)
                clss.append(cm)
                if m == 0:
                    min_d, sel_cls, sel_gx, sel_gy = dm, cm, gx, gy
                else:
                    better = dm < min_d                 # strict -> first argmin
                    min_d = jnp.where(better, dm, min_d)
                    sel_cls = jnp.where(better, cm, sel_cls)
                    sel_gx = jnp.where(better, gx, sel_gx)
                    sel_gy = jnp.where(better, gy, sel_gy)

            # ------------- classification (margin) loss, fused -------------
            mask0 = row_m * (min_d < cls_th).astype(jnp.float32)
            for m in range(M):
                mgn = sel_cls - clss[m]
                sel = (mask0
                       * ((dists[m] - min_d) > cls_ignore).astype(jnp.float32)
                       * (mgn < mgn_th).astype(jnp.float32))
                cls_n = cls_n + sel
                cls_l = cls_l + sel * (mgn_th - mgn)

            # ---------------- goal regression loss ----------------
            reg_l = reg_l + row_m * (_smooth_l1(sel_gx - lpx)
                                     + _smooth_l1(sel_gy - lpy))
            reg_n = reg_n + row_m

            return (cls_l, cls_n, reg_l, reg_n, mid_l, mid_n)

        zeros = jnp.zeros((SUB_S, LANE), jnp.float32)
        parts = jax.lax.fori_loop(0, n_sub, sub_body, (zeros,) * 6)

        # Accumulate into the resident output block (once per grid step).
        for i in range(6):
            o_ref[0, i] = o_ref[0, i] + parts[i]

    return kernel


def goal_loss(cls_list, goal_reg_list, mid_goal_list, loc_preds_list,
              has_preds_list, cfg=CONFIG, block_s=256, n_cores=2):
    """JAX/Pallas equivalent of GoalLoss.forward.

    cls:       list of [n_i, num_mods]
    goal_reg:  list of [n_i, num_mods, 1, 2]   (single goal step)
    mid:       list of [n_i, 2]
    loc_preds: list of [n_i, num_preds, 2]
    has_preds: list of [n_i, num_preds] bool

    Returns (out_vec[6], loss_out dict) where out_vec =
      [goal_cls_loss, goal_num_cls, goal_reg_loss, goal_num_reg,
       mid_goal_reg_loss, mid_goal_num_reg].
    """
    cls = jnp.concatenate(cls_list, 0).astype(jnp.float32)
    goal_reg = jnp.concatenate(goal_reg_list, 0).astype(jnp.float32)
    mid_goal = jnp.concatenate(mid_goal_list, 0).astype(jnp.float32)
    loc_preds = jnp.concatenate(loc_preds_list, 0).astype(jnp.float32)
    has_preds = jnp.concatenate(has_preds_list, 0)

    N, M = cls.shape
    P = loc_preds.shape[1]
    assert M == cfg["num_mods"] and P == cfg["num_preds"]
    mid_pos = P // 2 - 1
    F = 3 * M + 8

    # ---- precompute the two mask bits the kernel needs (drops has_preds) ----
    #   last_idcs == P-1  <=>  has[P-1] OR all(has == 0)
    #   last_idcs >= mid  <=>  any(has[mid:]) OR all(has == 0)
    any_has = jnp.any(has_preds, axis=1)
    row_mask = (has_preds[:, P - 1] | ~any_has).astype(jnp.float32)
    mid_mask = (jnp.any(has_preds[:, mid_pos:], axis=1) | ~any_has).astype(jnp.float32)

    # ----------------------- dense-plane packing -----------------------
    glx = goal_reg[:, :, -1, 0]            # [N, M]
    gly = goal_reg[:, :, -1, 1]            # [N, M]
    feats = jnp.concatenate(
        [cls.T,                            # planes 0..M-1
         glx.T,                            # planes M..2M-1
         gly.T,                            # planes 2M..3M-1
         loc_preds[:, -1, :].T,            # lpx, lpy
         loc_preds[:, mid_pos, :].T,       # lmx, lmy
         mid_goal.T,                       # mgx, mgy
         row_mask[None, :],
         mid_mask[None, :]], axis=0)       # [F, N]

    # ------------------------------ tiling ------------------------------
    S = max(1, _cdiv(N, LANE))                               # sublane rows used
    block_s = max(SUB_S, min(block_s, _round_up(S, SUB_S)))
    block_s = _round_up(block_s, SUB_S)
    n_cores = max(1, int(n_cores))
    blocks = _round_up(max(1, _cdiv(S, block_s)), n_cores)
    bpc = blocks // n_cores                                   # blocks per core
    S_pad = blocks * block_s
    N_pad = S_pad * LANE

    # Zero padding => row_mask = mid_mask = 0 for padded actors, so they
    # contribute exactly zero to every loss and count.
    feats = jnp.pad(feats, ((0, 0), (0, N_pad - N)))
    packed = feats.reshape(F, S_pad, LANE)                    # [F, S_pad, 128]

    kernel = _make_kernel(cfg, M, block_s)
    out = pl.pallas_call(
        kernel,
        out_shape=jax.ShapeDtypeStruct((n_cores, 6, SUB_S, LANE), jnp.float32),
        grid=(n_cores, bpc),
        in_specs=[
            pl.BlockSpec((F, block_s, LANE), lambda p, i: (0, p * bpc + i, 0)),
        ],
        out_specs=pl.BlockSpec((1, 6, SUB_S, LANE), lambda p, i: (p, 0, 0, 0)),
        compiler_params=pltpu.CompilerParams(
            dimension_semantics=("parallel", "arbitrary")),
    )(packed)

    # Tiny final reduction + coefficient scaling in the wrapper.
    raw = out.sum(axis=(0, 2, 3))                             # [6]
    coefs = jnp.array([cfg["goal_cls_coef"], 1.0,
                       cfg["goal_reg_coef"], 1.0,
                       cfg["mid_goal_reg_coef"], 1.0], jnp.float32)
    out_vec = raw * coefs

    # NOTE: counts are f32 sums (exact up to 2^24 actors).
    loss_out = {
        "goal_cls_loss": out_vec[0],
        "goal_num_cls": out_vec[1],
        "goal_reg_loss": out_vec[2],
        "goal_num_reg": out_vec[3],
        "mid_goal_reg_loss": out_vec[4],
        "mid_goal_num_reg": out_vec[5],
    }
    return out_vec, loss_out


# ---------------- NumPy reference (mirrors the PyTorch control flow) ----------
def numpy_ref(cls, goal_reg, mid_goal, loc_preds, has_preds, cfg):
    def sl1_sum(a, b):
        d = a - b
        ad = np.abs(d)
        return np.where(ad < 1.0, 0.5 * d * d, ad - 0.5).sum()

    P = cfg["num_preds"]
    M = cfg["num_mods"]
    mid_pos = P // 2 - 1
    last = has_preds.astype(np.float32) + 0.1 * np.arange(P, dtype=np.float32) / float(P)
    last_idcs = last.argmax(1)
    mask = last_idcs == P - 1
    mid_mask = last_idcs >= mid_pos

    mid_loss = cfg["mid_goal_reg_coef"] * sl1_sum(
        mid_goal[mid_mask], loc_preds[mid_mask][:, mid_pos, :])
    mid_num = int(mid_mask.sum())

    cls_m = cls[mask]
    gr = goal_reg[mask]
    lp = loc_preds[mask]
    li = last_idcs[mask]
    n = len(li)
    rows = np.arange(n)
    dist = np.stack(
        [np.sqrt(((gr[rows, j, -1] - lp[rows, li]) ** 2).sum(1)) for j in range(M)], 1)
    min_dist = dist.min(1)
    min_idcs = dist.argmin(1)
    mgn = cls_m[rows, min_idcs][:, None] - cls_m
    mask0 = (min_dist < cfg["cls_th"])[:, None]
    mask1 = dist - min_dist[:, None] > cfg["cls_ignore"]
    mgn_sel = mgn[mask0 & mask1]
    mm = mgn_sel < cfg["mgn"]
    cls_loss = cfg["goal_cls_coef"] * (cfg["mgn"] * mm.sum() - mgn_sel[mm].sum())
    num_cls = int(mm.sum())
    gr_sel = gr[rows, min_idcs]                       # [n, 1, 2]
    reg_loss = cfg["goal_reg_coef"] * sl1_sum(gr_sel, lp[:, -1, :][:, None, :])
    num_reg = n
    return np.array([cls_loss, num_cls, reg_loss, num_reg, mid_loss, mid_num],
                    dtype=np.float32)


if __name__ == "__main__":
    cfg = CONFIG
    M, P = cfg["num_mods"], cfg["num_preds"]
    key = jax.random.PRNGKey(0)

    # (N, block_s, n_cores): exercises tiny-shape shrink, single-core path,
    # and multi-block accumulation across the arbitrary grid axis + inner loop.
    cases = [(8, 256, 2), (300, 8, 1), (5000, 16, 2)]
    for (N, block_s, n_cores) in cases:
        k1, k2, k3, k4, k5, key = jax.random.split(key, 6)
        cls = jax.random.normal(k1, (N, M), jnp.float32)
        goal_reg = 2.0 * jax.random.normal(k2, (N, M, 1, 2), jnp.float32)
        mid_goal = jax.random.normal(k3, (N, 2), jnp.float32)
        loc_preds = jax.random.normal(k4, (N, P, 2), jnp.float32)
        has_preds = jax.random.uniform(k5, (N, P)) > 0.3

        out_vec, loss_out = goal_loss([cls], [goal_reg], [mid_goal],
                                      [loc_preds], [has_preds], cfg,
                                      block_s=block_s, n_cores=n_cores)
        jax.block_until_ready(out_vec)

        ref = numpy_ref(np.asarray(cls), np.asarray(goal_reg), np.asarray(mid_goal),
                        np.asarray(loc_preds), np.asarray(has_preds), cfg)
        got = np.asarray(out_vec)
        assert np.allclose(got, ref, rtol=2e-4, atol=2e-3), (N, got, ref)

    print("KERNEL_OK")
</pallas_src>

<mosaic_0001>
module attributes {stable_mosaic.version = 11 : i64} {
  func.func @kernel(%arg0: i32, %arg1: i32, %arg2: memref<26x8x128xf32, #tpu.memory_space<vmem>>, %arg3: memref<1x6x8x128xf32, #tpu.memory_space<vmem>>) attributes {dimension_semantics = [#tpu.dimension_semantics<parallel>, #tpu.dimension_semantics<arbitrary>], iteration_bounds = array<i64: 2, 1>, scalar_prefetch = 0 : i64, scratch_operands = 0 : i64, tpu.core_type = #tpu.core_type<tc>, window_params = [{transform_indices = @transform_0, window_bounds = array<i64: 26, 8, 128>}, {transform_indices = @transform_1, window_bounds = array<i64: 1, 6, 8, 128>}]} {
    %c0_i32 = arith.constant 0 : i32
    %0 = arith.cmpi eq, %arg1, %c0_i32 : i32
    %1 = arith.extui %0 : i1 to i32
    %c0_i32_0 = arith.constant 0 : i32
    %2 = arith.cmpi ne, %1, %c0_i32_0 : i32
    scf.if %2 {
      %cst_107 = arith.constant 0.000000e+00 : f32
      %336 = vector.broadcast %cst_107 : f32 to vector<1x6x8x128xf32>
      %c0_108 = arith.constant 0 : index
      %c0_109 = arith.constant 0 : index
      %c0_110 = arith.constant 0 : index
      %c0_111 = arith.constant 0 : index
      %337 = vector.load %arg3[%c0_108, %c0_109, %c0_110, %c0_111] : memref<1x6x8x128xf32, #tpu.memory_space<vmem>>, vector<1x6x8x128xf32>
      tpu.vector_store %arg3[%c0_108, %c0_109, %c0_110, %c0_111], %336 {strides = array<i32>} : memref<1x6x8x128xf32, #tpu.memory_space<vmem>>, vector<1x6x8x128xf32>,
    } else {
    }
    %cst = arith.constant 0.000000e+00 : f32
    %3 = vector.broadcast %cst : f32 to vector<8x128xf32>
    %c0_i32_1 = arith.constant 0 : i32
    %c8_i32 = arith.constant 8 : i32
    %4 = arith.muli %c0_i32_1, %c8_i32 : i32
    %5 = tpu.assume_multiple %4, 8 : i32
    %c24 = arith.constant 24 : index
    %6 = arith.index_cast %5 : i32 to index
    %c0 = arith.constant 0 : index
    %7 = vector.load %arg2[%c24, %6, %c0] : memref<26x8x128xf32, #tpu.memory_space<vmem>>, vector<1x8x128xf32>
    %8 = vector.shape_cast %7 : vector<1x8x128xf32> to vector<8x128xf32>
    %c25 = arith.constant 25 : index
    %9 = arith.index_cast %5 : i32 to index
    %c0_2 = arith.constant 0 : index
    %10 = vector.load %arg2[%c25, %9, %c0_2] : memref<26x8x128xf32, #tpu.memory_space<vmem>>, vector<1x8x128xf32>
    %11 = vector.shape_cast %10 : vector<1x8x128xf32> to vector<8x128xf32>
    %c18 = arith.constant 18 : index
    %12 = arith.index_cast %5 : i32 to index
    %c0_3 = arith.constant 0 : index
    %13 = vector.load %arg2[%c18, %12, %c0_3] : memref<26x8x128xf32, #tpu.memory_space<vmem>>, vector<1x8x128xf32>
    %14 = vector.shape_cast %13 : vector<1x8x128xf32> to vector<8x128xf32>
    %c19 = arith.constant 19 : index
    %15 = arith.index_cast %5 : i32 to index
    %c0_4 = arith.constant 0 : index
    %16 = vector.load %arg2[%c19, %15, %c0_4] : memref<26x8x128xf32, #tpu.memory_space<vmem>>, vector<1x8x128xf32>
    %17 = vector.shape_cast %16 : vector<1x8x128xf32> to vector<8x128xf32>
    %c20 = arith.constant 20 : index
    %18 = arith.index_cast %5 : i32 to index
    %c0_5 = arith.constant 0 : index
    %19 = vector.load %arg2[%c20, %18, %c0_5] : memref<26x8x128xf32, #tpu.memory_space<vmem>>, vector<1x8x128xf32>
    %20 = vector.shape_cast %19 : vector<1x8x128xf32> to vector<8x128xf32>
    %c21 = arith.constant 21 : index
    %21 = arith.index_cast %5 : i32 to index
    %c0_6 = arith.constant 0 : index
    %22 = vector.load %arg2[%c21, %21, %c0_6] : memref<26x8x128xf32, #tpu.memory_space<vmem>>, vector<1x8x128xf32>
    %23 = vector.shape_cast %22 : vector<1x8x128xf32> to vector<8x128xf32>
    %c22 = arith.constant 22 : index
    %24 = arith.index_cast %5 : i32 to index
    %c0_7 = arith.constant 0 : index
    %25 = vector.load %arg2[%c22, %24, %c0_7] : memref<26x8x128xf32, #tpu.memory_space<vmem>>, vector<1x8x128xf32>
    %26 = vector.shape_cast %25 : vector<1x8x128xf32> to vector<8x128xf32>
    %c23 = arith.constant 23 : index
    %27 = arith.index_cast %5 : i32 to index
    %c0_8 = arith.constant 0 : index
    %28 = vector.load %arg2[%c23, %27, %c0_8] : memref<26x8x128xf32, #tpu.memory_space<vmem>>, vector<1x8x128xf32>
    %29 = vector.shape_cast %28 : vector<1x8x128xf32> to vector<8x128xf32>
    %30 = arith.subf %26, %20 : vector<8x128xf32>
    %31 = math.absf %30 : vector<8x128xf32>
    %cst_9 = arith.constant 1.000000e+00 : f32
    %32 = vector.broadcast %cst_9 : f32 to vector<8x128xf32>
    %33 = arith.cmpf olt, %31, %32 : vector<8x128xf32>
    %cst_10 = arith.constant 5.000000e-01 : f32
    %34 = vector.broadcast %cst_10 : f32 to vector<8x128xf32>
    %35 = arith.mulf %34, %30 : vector<8x128xf32>
    %36 = arith.mulf %35, %30 : vector<8x128xf32>
    %cst_11 = arith.constant 5.000000e-01 : f32
    %37 = vector.broadcast %cst_11 : f32 to vector<8x128xf32>
    %38 = arith.subf %31, %37 : vector<8x128xf32>
    %39 = arith.select %33, %36, %38 : vector<8x128xi1>, vector<8x128xf32>
    %40 = arith.subf %29, %23 : vector<8x128xf32>
    %41 = math.absf %40 : vector<8x128xf32>
    %cst_12 = arith.constant 1.000000e+00 : f32
    %42 = vector.broadcast %cst_12 : f32 to vector<8x128xf32>
    %43 = arith.cmpf olt, %41, %42 : vector<8x128xf32>
    %cst_13 = arith.constant 5.000000e-01 : f32
    %44 = vector.broadcast %cst_13 : f32 to vector<8x128xf32>
    %45 = arith.mulf %44, %40 : vector<8x128xf32>
    %46 = arith.mulf %45, %40 : vector<8x128xf32>
    %cst_14 = arith.constant 5.000000e-01 : f32
    %47 = vector.broadcast %cst_14 : f32 to vector<8x128xf32>
    %48 = arith.subf %41, %47 : vector<8x128xf32>
    %49 = arith.select %43, %46, %48 : vector<8x128xi1>, vector<8x128xf32>
    %50 = arith.addf %39, %49 : vector<8x128xf32>
    %51 = arith.mulf %11, %50 : vector<8x128xf32>
    %52 = arith.addf %3, %51 : vector<8x128xf32>
    %53 = arith.addf %3, %11 : vector<8x128xf32>
    %c6 = arith.constant 6 : index
    %54 = arith.index_cast %5 : i32 to index
    %c0_15 = arith.constant 0 : index
    %55 = vector.load %arg2[%c6, %54, %c0_15] : memref<26x8x128xf32, #tpu.memory_space<vmem>>, vector<1x8x128xf32>
    %56 = vector.shape_cast %55 : vector<1x8x128xf32> to vector<8x128xf32>
    %c12 = arith.constant 12 : index
    %57 = arith.index_cast %5 : i32 to index
    %c0_16 = arith.constant 0 : index
    %58 = vector.load %arg2[%c12, %57, %c0_16] : memref<26x8x128xf32, #tpu.memory_space<vmem>>, vector<1x8x128xf32>
    %59 = vector.shape_cast %58 : vector<1x8x128xf32> to vector<8x128xf32>
    %c0_17 = arith.constant 0 : index
    %60 = arith.index_cast %5 : i32 to index
    %c0_18 = arith.constant 0 : index
    %61 = vector.load %arg2[%c0_17, %60, %c0_18] : memref<26x8x128xf32, #tpu.memory_space<vmem>>, vector<1x8x128xf32>
    %62 = vector.shape_cast %61 : vector<1x8x128xf32> to vector<8x128xf32>
    %63 = arith.subf %56, %14 : vector<8x128xf32>
    %64 = arith.subf %59, %17 : vector<8x128xf32>
    %65 = arith.mulf %63, %63 : vector<8x128xf32>
    %66 = arith.mulf %64, %64 : vector<8x128xf32>
    %67 = arith.addf %65, %66 : vector<8x128xf32>
    %68 = math.sqrt %67 : vector<8x128xf32>
    %c7 = arith.constant 7 : index
    %69 = arith.index_cast %5 : i32 to index
    %c0_19 = arith.constant 0 : index
    %70 = vector.load %arg2[%c7, %69, %c0_19] : memref<26x8x128xf32, #tpu.memory_space<vmem>>, vector<1x8x128xf32>
    %71 = vector.shape_cast %70 : vector<1x8x128xf32> to vector<8x128xf32>
    %c13 = arith.constant 13 : index
    %72 = arith.index_cast %5 : i32 to index
    %c0_20 = arith.constant 0 : index
    %73 = vector.load %arg2[%c13, %72, %c0_20] : memref<26x8x128xf32, #tpu.memory_space<vmem>>, vector<1x8x128xf32>
    %74 = vector.shape_cast %73 : vector<1x8x128xf32> to vector<8x128xf32>
    %c1 = arith.constant 1 : index
    %75 = arith.index_cast %5 : i32 to index
    %c0_21 = arith.constant 0 : index
    %76 = vector.load %arg2[%c1, %75, %c0_21] : memref<26x8x128xf32, #tpu.memory_space<vmem>>, vector<1x8x128xf32>
    %77 = vector.shape_cast %76 : vector<1x8x128xf32> to vector<8x128xf32>
    %78 = arith.subf %71, %14 : vector<8x128xf32>
    %79 = arith.subf %74, %17 : vector<8x128xf32>
    %80 = arith.mulf %78, %78 : vector<8x128xf32>
    %81 = arith.mulf %79, %79 : vector<8x128xf32>
    %82 = arith.addf %80, %81 : vector<8x128xf32>
    %83 = math.sqrt %82 : vector<8x128xf32>
    %84 = arith.cmpf olt, %83, %68 : vector<8x128xf32>
    %85 = arith.select %84, %83, %68 : vector<8x128xi1>, vector<8x128xf32>
    %86 = arith.select %84, %77, %62 : vector<8x128xi1>, vector<8x128xf32>
    %87 = arith.select %84, %71, %56 : vector<8x128xi1>, vector<8x128xf32>
    %88 = arith.select %84, %74, %59 : vector<8x128xi1>, vector<8x128xf32>
    %c8 = arith.constant 8 : index
    %89 = arith.index_cast %5 : i32 to index
    %c0_22 = arith.constant 0 : index
    %90 = vector.load %arg2[%c8, %89, %c0_22] : memref<26x8x128xf32, #tpu.memory_space<vmem>>, vector<1x8x128xf32>
    %91 = vector.shape_cast %90 : vector<1x8x128xf32> to vector<8x128xf32>
    %c14 = arith.constant 14 : index
    %92 = arith.index_cast %5 : i32 to index
    %c0_23 = arith.constant 0 : index
    %93 = vector.load %arg2[%c14, %92, %c0_23] : memref<26x8x128xf32, #tpu.memory_space<vmem>>, vector<1x8x128xf32>
    %94 = vector.shape_cast %93 : vector<1x8x128xf32> to vector<8x128xf32>
    %c2 = arith.constant 2 : index
    %95 = arith.index_cast %5 : i32 to index
    %c0_24 = arith.constant 0 : index
    %96 = vector.load %arg2[%c2, %95, %c0_24] : memref<26x8x128xf32, #tpu.memory_space<vmem>>, vector<1x8x128xf32>
    %97 = vector.shape_cast %96 : vector<1x8x128xf32> to vector<8x128xf32>
    %98 = arith.subf %91, %14 : vector<8x128xf32>
    %99 = arith.subf %94, %17 : vector<8x128xf32>
    %100 = arith.mulf %98, %98 : vector<8x128xf32>
    %101 = arith.mulf %99, %99 : vector<8x128xf32>
    %102 = arith.addf %100, %101 : vector<8x128xf32>
    %103 = math.sqrt %102 : vector<8x128xf32>
    %104 = arith.cmpf olt, %103, %85 : vector<8x128xf32>
    %105 = arith.select %104, %103, %85 : vector<8x128xi1>, vector<8x128xf32>
    %106 = arith.select %104, %97, %86 : vector<8x128xi1>, vector<8x128xf32>
    %107 = arith.select %104, %91, %87 : vector<8x128xi1>, vector<8x128xf32>
    %108 = arith.select %104, %94, %88 : vector<8x128xi1>, vector<8x128xf32>
    %c9 = arith.constant 9 : index
    %109 = arith.index_cast %5 : i32 to index
    %c0_25 = arith.constant 0 : index
    %110 = vector.load %arg2[%c9, %109, %c0_25] : memref<26x8x128xf32, #tpu.memory_space<vmem>>, vector<1x8x128xf32>
    %111 = vector.shape_cast %110 : vector<1x8x128xf32> to vector<8x128xf32>
    %c15 = arith.constant 15 : index
    %112 = arith.index_cast %5 : i32 to index
    %c0_26 = arith.constant 0 : index
    %113 = vector.load %arg2[%c15, %112, %c0_26] : memref<26x8x128xf32, #tpu.memory_space<vmem>>, vector<1x8x128xf32>
    %114 = vector.shape_cast %113 : vector<1x8x128xf32> to vector<8x128xf32>
    %c3 = arith.constant 3 : index
    %115 = arith.index_cast %5 : i32 to index
    %c0_27 = arith.constant 0 : index
    %116 = vector.load %arg2[%c3, %115, %c0_27] : memref<26x8x128xf32, #tpu.memory_space<vmem>>, vector<1x8x128xf32>
    %117 = vector.shape_cast %116 : vector<1x8x128xf32> to vector<8x128xf32>
    %118 = arith.subf %111, %14 : vector<8x128xf32>
    %119 = arith.subf %114, %17 : vector<8x128xf32>
    %120 = arith.mulf %118, %118 : vector<8x128xf32>
    %121 = arith.mulf %119, %119 : vector<8x128xf32>
    %122 = arith.addf %120, %121 : vector<8x128xf32>
    %123 = math.sqrt %122 : vector<8x128xf32>
    %124 = arith.cmpf olt, %123, %105 : vector<8x128xf32>
    %125 = arith.select %124, %123, %105 : vector<8x128xi1>, vector<8x128xf32>
    %126 = arith.select %124, %117, %106 : vector<8x128xi1>, vector<8x128xf32>
    %127 = arith.select %124, %111, %107 : vector<8x128xi1>, vector<8x128xf32>
    %128 = arith.select %124, %114, %108 : vector<8x128xi1>, vector<8x128xf32>
    %c10 = arith.constant 10 : index
    %129 = arith.index_cast %5 : i32 to index
    %c0_28 = arith.constant 0 : index
    %130 = vector.load %arg2[%c10, %129, %c0_28] : memref<26x8x128xf32, #tpu.memory_space<vmem>>, vector<1x8x128xf32>
    %131 = vector.shape_cast %130 : vector<1x8x128xf32> to vector<8x128xf32>
    %c16 = arith.constant 16 : index
    %132 = arith.index_cast %5 : i32 to index
    %c0_29 = arith.constant 0 : index
    %133 = vector.load %arg2[%c16, %132, %c0_29] : memref<26x8x128xf32, #tpu.memory_space<vmem>>, vector<1x8x128xf32>
    %134 = vector.shape_cast %133 : vector<1x8x128xf32> to vector<8x128xf32>
    %c4 = arith.constant 4 : index
    %135 = arith.index_cast %5 : i32 to index
    %c0_30 = arith.constant 0 : index
    %136 = vector.load %arg2[%c4, %135, %c0_30] : memref<26x8x128xf32, #tpu.memory_space<vmem>>, vector<1x8x128xf32>
    %137 = vector.shape_cast %136 : vector<1x8x128xf32> to vector<8x128xf32>
    %138 = arith.subf %131, %14 : vector<8x128xf32>
    %139 = arith.subf %134, %17 : vector<8x128xf32>
    %140 = arith.mulf %138, %138 : vector<8x128xf32>
    %141 = arith.mulf %139, %139 : vector<8x128xf32>
    %142 = arith.addf %140, %141 : vector<8x128xf32>
    %143 = math.sqrt %142 : vector<8x128xf32>
    %144 = arith.cmpf olt, %143, %125 : vector<8x128xf32>
    %145 = arith.select %144, %143, %125 : vector<8x128xi1>, vector<8x128xf32>
    %146 = arith.select %144, %137, %126 : vector<8x128xi1>, vector<8x128xf32>
    %147 = arith.select %144, %131, %127 : vector<8x128xi1>, vector<8x128xf32>
    %148 = arith.select %144, %134, %128 : vector<8x128xi1>, vector<8x128xf32>
    %c11 = arith.constant 11 : index
    %149 = arith.index_cast %5 : i32 to index
    %c0_31 = arith.constant 0 : index
    %150 = vector.load %arg2[%c11, %149, %c0_31] : memref<26x8x128xf32, #tpu.memory_space<vmem>>, vector<1x8x128xf32>
    %151 = vector.shape_cast %150 : vector<1x8x128xf32> to vector<8x128xf32>
    %c17 = arith.constant 17 : index
    %152 = arith.index_cast %5 : i32 to index
    %c0_32 = arith.constant 0 : index
    %153 = vector.load %arg2[%c17, %152, %c0_32] : memref<26x8x128xf32, #tpu.memory_space<vmem>>, vector<1x8x128xf32>
    %154 = vector.shape_cast %153 : vector<1x8x128xf32> to vector<8x128xf32>
    %c5 = arith.constant 5 : index
    %155 = arith.index_cast %5 : i32 to index
    %c0_33 = arith.constant 0 : index
    %156 = vector.load %arg2[%c5, %155, %c0_33] : memref<26x8x128xf32, #tpu.memory_space<vmem>>, vector<1x8x128xf32>
    %157 = vector.shape_cast %156 : vector<1x8x128xf32> to vector<8x128xf32>
    %158 = arith.subf %151, %14 : vector<8x128xf32>
    %159 = arith.subf %154, %17 : vector<8x128xf32>
    %160 = arith.mulf %158, %158 : vector<8x128xf32>
    %161 = arith.mulf %159, %159 : vector<8x128xf32>
    %162 = arith.addf %160, %161 : vector<8x128xf32>
    %163 = math.sqrt %162 : vector<8x128xf32>
    %164 = arith.cmpf olt, %163, %145 : vector<8x128xf32>
    %165 = arith.select %164, %163, %145 : vector<8x128xi1>, vector<8x128xf32>
    %166 = arith.select %164, %157, %146 : vector<8x128xi1>, vector<8x128xf32>
    %167 = arith.select %164, %151, %147 : vector<8x128xi1>, vector<8x128xf32>
    %168 = arith.select %164, %154, %148 : vector<8x128xi1>, vector<8x128xf32>
    %cst_34 = arith.constant 2.000000e+00 : f32
    %169 = vector.broadcast %cst_34 : f32 to vector<8x128xf32>
    %170 = arith.cmpf olt, %165, %169 : vector<8x128xf32>
    %171 = arith.extui %170 : vector<8x128xi1> to vector<8x128xi32>
    %172 = arith.sitofp %171 : vector<8x128xi32> to vector<8x128xf32>
    %173 = arith.mulf %8, %172 : vector<8x128xf32>
    %174 = arith.subf %166, %62 : vector<8x128xf32>
    %175 = arith.subf %68, %165 : vector<8x128xf32>
    %cst_35 = arith.constant 2.000000e-01 : f32
    %176 = vector.broadcast %cst_35 : f32 to vector<8x128xf32>
    %177 = arith.cmpf ogt, %175, %176 : vector<8x128xf32>
    %178 = arith.extui %177 : vector<8x128xi1> to vector<8x128xi32>
    %179 = arith.sitofp %178 : vector<8x128xi32> to vector<8x128xf32>
    %180 = arith.mulf %173, %179 : vector<8x128xf32>
    %cst_36 = arith.constant 2.000000e-01 : f32
    %181 = vector.broadcast %cst_36 : f32 to vector<8x128xf32>
    %182 = arith.cmpf olt, %174, %181 : vector<8x128xf32>
    %183 = arith.extui %182 : vector<8x128xi1> to vector<8x128xi32>
    %184 = arith.sitofp %183 : vector<8x128xi32> to vector<8x128xf32>
    %185 = arith.mulf %180, %184 : vector<8x128xf32>
    %186 = arith.addf %3, %185 : vector<8x128xf32>
    %cst_37 = arith.constant 2.000000e-01 : f32
    %187 = vector.broadcast %cst_37 : f32 to vector<8x128xf32>
    %188 = arith.subf %187, %174 : vector<8x128xf32>
    %189 = arith.mulf %185, %188 : vector<8x128xf32>
    %190 = arith.addf %3, %189 : vector<8x128xf32>
    %191 = arith.subf %166, %77 : vector<8x128xf32>
    %192 = arith.subf %83, %165 : vector<8x128xf32>
    %cst_38 = arith.constant 2.000000e-01 : f32
    %193 = vector.broadcast %cst_38 : f32 to vector<8x128xf32>
    %194 = arith.cmpf ogt, %192, %193 : vector<8x128xf32>
    %195 = arith.extui %194 : vector<8x128xi1> to vector<8x128xi32>
    %196 = arith.sitofp %195 : vector<8x128xi32> to vector<8x128xf32>
    %197 = arith.mulf %173, %196 : vector<8x128xf32>
    %cst_39 = arith.constant 2.000000e-01 : f32
    %198 = vector.broadcast %cst_39 : f32 to vector<8x128xf32>
    %199 = arith.cmpf olt, %191, %198 : vector<8x128xf32>
    %200 = arith.extui %199 : vector<8x128xi1> to vector<8x128xi32>
    %201 = arith.sitofp %200 : vector<8x128xi32> to vector<8x128xf32>
    %202 = arith.mulf %197, %201 : vector<8x128xf32>
    %203 = arith.addf %186, %202 : vector<8x128xf32>
    %cst_40 = arith.constant 2.000000e-01 : f32
    %204 = vector.broadcast %cst_40 : f32 to vector<8x128xf32>
    %205 = arith.subf %204, %191 : vector<8x128xf32>
    %206 = arith.mulf %202, %205 : vector<8x128xf32>
    %207 = arith.addf %190, %206 : vector<8x128xf32>
    %208 = arith.subf %166, %97 : vector<8x128xf32>
    %209 = arith.subf %103, %165 : vector<8x128xf32>
    %cst_41 = arith.constant 2.000000e-01 : f32
    %210 = vector.broadcast %cst_41 : f32 to vector<8x128xf32>
    %211 = arith.cmpf ogt, %209, %210 : vector<8x128xf32>
    %212 = arith.extui %211 : vector<8x128xi1> to vector<8x128xi32>
    %213 = arith.sitofp %212 : vector<8x128xi32> to vector<8x128xf32>
    %214 = arith.mulf %173, %213 : vector<8x128xf32>
    %cst_42 = arith.constant 2.000000e-01 : f32
    %215 = vector.broadcast %cst_42 : f32 to vector<8x128xf32>
    %216 = arith.cmpf olt, %208, %215 : vector<8x128xf32>
    %217 = arith.extui %216 : vector<8x128xi1> to vector<8x128xi32>
    %218 = arith.sitofp %217 : vector<8x128xi32> to vector<8x128xf32>
    %219 = arith.mulf %214, %218 : vector<8x128xf32>
    %220 = arith.addf %203, %219 : vector<8x128xf32>
    %cst_43 = arith.constant 2.000000e-01 : f32
    %221 = vector.broadcast %cst_43 : f32 to vector<8x128xf32>
    %222 = arith.subf %221, %208 : vector<8x128xf32>
    %223 = arith.mulf %219, %222 : vector<8x128xf32>
    %224 = arith.addf %207, %223 : vector<8x128xf32>
    %225 = arith.subf %166, %117 : vector<8x128xf32>
    %226 = arith.subf %123, %165 : vector<8x128xf32>
    %cst_44 = arith.constant 2.000000e-01 : f32
    %227 = vector.broadcast %cst_44 : f32 to vector<8x128xf32>
    %228 = arith.cmpf ogt, %226, %227 : vector<8x128xf32>
    %229 = arith.extui %228 : vector<8x128xi1> to vector<8x128xi32>
    %230 = arith.sitofp %229 : vector<8x128xi32> to vector<8x128xf32>
    %231 = arith.mulf %173, %230 : vector<8x128xf32>
    %cst_45 = arith.constant 2.000000e-01 : f32
    %232 = vector.broadcast %cst_45 : f32 to vector<8x128xf32>
    %233 = arith.cmpf olt, %225, %232 : vector<8x128xf32>
    %234 = arith.extui %233 : vector<8x128xi1> to vector<8x128xi32>
    %235 = arith.sitofp %234 : vector<8x128xi32> to vector<8x128xf32>
    %236 = arith.mulf %231, %235 : vector<8x128xf32>
    %237 = arith.addf %220, %236 : vector<8x128xf32>
    %cst_46 = arith.constant 2.000000e-01 : f32
    %238 = vector.broadcast %cst_46 : f32 to vector<8x128xf32>
    %239 = arith.subf %238, %225 : vector<8x128xf32>
    %240 = arith.mulf %236, %239 : vector<8x128xf32>
    %241 = arith.addf %224, %240 : vector<8x128xf32>
    %242 = arith.subf %166, %137 : vector<8x128xf32>
    %243 = arith.subf %143, %165 : vector<8x128xf32>
    %cst_47 = arith.constant 2.000000e-01 : f32
    %244 = vector.broadcast %cst_47 : f32 to vector<8x128xf32>
    %245 = arith.cmpf ogt, %243, %244 : vector<8x128xf32>
    %246 = arith.extui %245 : vector<8x128xi1> to vector<8x128xi32>
    %247 = arith.sitofp %246 : vector<8x128xi32> to vector<8x128xf32>
    %248 = arith.mulf %173, %247 : vector<8x128xf32>
    %cst_48 = arith.constant 2.000000e-01 : f32
    %249 = vector.broadcast %cst_48 : f32 to vector<8x128xf32>
    %250 = arith.cmpf olt, %242, %249 : vector<8x128xf32>
    %251 = arith.extui %250 : vector<8x128xi1> to vector<8x128xi32>
    %252 = arith.sitofp %251 : vector<8x128xi32> to vector<8x128xf32>
    %253 = arith.mulf %248, %252 : vector<8x128xf32>
    %254 = arith.addf %237, %253 : vector<8x128xf32>
    %cst_49 = arith.constant 2.000000e-01 : f32
    %255 = vector.broadcast %cst_49 : f32 to vector<8x128xf32>
    %256 = arith.subf %255, %242 : vector<8x128xf32>
    %257 = arith.mulf %253, %256 : vector<8x128xf32>
    %258 = arith.addf %241, %257 : vector<8x128xf32>
    %259 = arith.subf %166, %157 : vector<8x128xf32>
    %260 = arith.subf %163, %165 : vector<8x128xf32>
    %cst_50 = arith.constant 2.000000e-01 : f32
    %261 = vector.broadcast %cst_50 : f32 to vector<8x128xf32>
    %262 = arith.cmpf ogt, %260, %261 : vector<8x128xf32>
    %263 = arith.extui %262 : vector<8x128xi1> to vector<8x128xi32>
    %264 = arith.sitofp %263 : vector<8x128xi32> to vector<8x128xf32>
    %265 = arith.mulf %173, %264 : vector<8x128xf32>
    %cst_51 = arith.constant 2.000000e-01 : f32
    %266 = vector.broadcast %cst_51 : f32 to vector<8x128xf32>
    %267 = arith.cmpf olt, %259, %266 : vector<8x128xf32>
    %268 = arith.extui %267 : vector<8x128xi1> to vector<8x128xi32>
    %269 = arith.sitofp %268 : vector<8x128xi32> to vector<8x128xf32>
    %270 = arith.mulf %265, %269 : vector<8x128xf32>
    %271 = arith.addf %254, %270 : vector<8x128xf32>
    %cst_52 = arith.constant 2.000000e-01 : f32
    %272 = vector.broadcast %cst_52 : f32 to vector<8x128xf32>
    %273 = arith.subf %272, %259 : vector<8x128xf32>
    %274 = arith.mulf %270, %273 : vector<8x128xf32>
    %275 = arith.addf %258, %274 : vector<8x128xf32>
    %276 = arith.subf %167, %14 : vector<8x128xf32>
    %277 = math.absf %276 : vector<8x128xf32>
    %cst_53 = arith.constant 1.000000e+00 : f32
    %278 = vector.broadcast %cst_53 : f32 to vector<8x128xf32>
    %279 = arith.cmpf olt, %277, %278 : vector<8x128xf32>
    %cst_54 = arith.constant 5.000000e-01 : f32
    %280 = vector.broadcast %cst_54 : f32 to vector<8x128xf32>
    %281 = arith.mulf %280, %276 : vector<8x128xf32>
    %282 = arith.mulf %281, %276 : vector<8x128xf32>
    %cst_55 = arith.constant 5.000000e-01 : f32
    %283 = vector.broadcast %cst_55 : f32 to vector<8x128xf32>
    %284 = arith.subf %277, %283 : vector<8x128xf32>
    %285 = arith.select %279, %282, %284 : vector<8x128xi1>, vector<8x128xf32>
    %286 = arith.subf %168, %17 : vector<8x128xf32>
    %287 = math.absf %286 : vector<8x128xf32>
    %cst_56 = arith.constant 1.000000e+00 : f32
    %288 = vector.broadcast %cst_56 : f32 to vector<8x128xf32>
    %289 = arith.cmpf olt, %287, %288 : vector<8x128xf32>
    %cst_57 = arith.constant 5.000000e-01 : f32
    %290 = vector.broadcast %cst_57 : f32 to vector<8x128xf32>
    %291 = arith.mulf %290, %286 : vector<8x128xf32>
    %292 = arith.mulf %291, %286 : vector<8x128xf32>
    %cst_58 = arith.constant 5.000000e-01 : f32
    %293 = vector.broadcast %cst_58 : f32 to vector<8x128xf32>
    %294 = arith.subf %287, %293 : vector<8x128xf32>
    %295 = arith.select %289, %292, %294 : vector<8x128xi1>, vector<8x128xf32>
    %296 = arith.addf %285, %295 : vector<8x128xf32>
    %297 = arith.mulf %8, %296 : vector<8x128xf32>
    %298 = arith.addf %3, %297 : vector<8x128xf32>
    %299 = arith.addf %3, %8 : vector<8x128xf32>
    %c1_i32 = arith.constant 1 : i32
    %c0_59 = arith.constant 0 : index
    %c0_60 = arith.constant 0 : index
    %c0_61 = arith.constant 0 : index
    %c0_62 = arith.constant 0 : index
    %300 = vector.load %arg3[%c0_59, %c0_60, %c0_61, %c0_62] : memref<1x6x8x128xf32, #tpu.memory_space<vmem>>, vector<1x1x8x128xf32>
    %301 = vector.shape_cast %300 : vector<1x1x8x128xf32> to vector<8x128xf32>
    %302 = arith.addf %301, %275 : vector<8x128xf32>
    %c0_63 = arith.constant 0 : index
    %c0_64 = arith.constant 0 : index
    %c0_65 = arith.constant 0 : index
    %c0_66 = arith.constant 0 : index
    %303 = vector.load %arg3[%c0_63, %c0_64, %c0_65, %c0_66] : memref<1x6x8x128xf32, #tpu.memory_space<vmem>>, vector<1x1x8x128xf32>
    %304 = vector.shape_cast %303 : vector<1x1x8x128xf32> to vector<8x128xf32>
    %305 = vector.shape_cast %302 : vector<8x128xf32> to vector<1x1x8x128xf32>
    tpu.vector_store %arg3[%c0_63, %c0_64, %c0_65, %c0_66], %305 {strides = array<i32>} : memref<1x6x8x128xf32, #tpu.memory_space<vmem>>, vector<1x1x8x128xf32>,
    %c0_67 = arith.constant 0 : index
    %c1_68 = arith.constant 1 : index
    %c0_69 = arith.constant 0 : index
    %c0_70 = arith.constant 0 : index
    %306 = vector.load %arg3[%c0_67, %c1_68, %c0_69, %c0_70] : memref<1x6x8x128xf32, #tpu.memory_space<vmem>>, vector<1x1x8x128xf32>
    %307 = vector.shape_cast %306 : vector<1x1x8x128xf32> to vector<8x128xf32>
    %308 = arith.addf %307, %271 : vector<8x128xf32>
    %c0_71 = arith.constant 0 : index
    %c1_72 = arith.constant 1 : index
    %c0_73 = arith.constant 0 : index
    %c0_74 = arith.constant 0 : index
    %309 = vector.load %arg3[%c0_71, %c1_72, %c0_73, %c0_74] : memref<1x6x8x128xf32, #tpu.memory_space<vmem>>, vector<1x1x8x128xf32>
    %310 = vector.shape_cast %309 : vector<1x1x8x128xf32> to vector<8x128xf32>
    %311 = vector.shape_cast %308 : vector<8x128xf32> to vector<1x1x8x128xf32>
    tpu.vector_store %arg3[%c0_71, %c1_72, %c0_73, %c0_74], %311 {strides = array<i32>} : memref<1x6x8x128xf32, #tpu.memory_space<vmem>>, vector<1x1x8x128xf32>,
    %c0_75 = arith.constant 0 : index
    %c2_76 = arith.constant 2 : index
    %c0_77 = arith.constant 0 : index
    %c0_78 = arith.constant 0 : index
    %312 = vector.load %arg3[%c0_75, %c2_76, %c0_77, %c0_78] : memref<1x6x8x128xf32, #tpu.memory_space<vmem>>, vector<1x1x8x128xf32>
    %313 = vector.shape_cast %312 : vector<1x1x8x128xf32> to vector<8x128xf32>
    %314 = arith.addf %313, %298 : vector<8x128xf32>
    %c0_79 = arith.constant 0 : index
    %c2_80 = arith.constant 2 : index
    %c0_81 = arith.constant 0 : index
    %c0_82 = arith.constant 0 : index
    %315 = vector.load %arg3[%c0_79, %c2_80, %c0_81, %c0_82] : memref<1x6x8x128xf32, #tpu.memory_space<vmem>>, vector<1x1x8x128xf32>
    %316 = vector.shape_cast %315 : vector<1x1x8x128xf32> to vector<8x128xf32>
    %317 = vector.shape_cast %314 : vector<8x128xf32> to vector<1x1x8x128xf32>
    tpu.vector_store %arg3[%c0_79, %c2_80, %c0_81, %c0_82], %317 {strides = array<i32>} : memref<1x6x8x128xf32, #tpu.memory_space<vmem>>, vector<1x1x8x128xf32>,
    %c0_83 = arith.constant 0 : index
    %c3_84 = arith.constant 3 : index
    %c0_85 = arith.constant 0 : index
    %c0_86 = arith.constant 0 : index
    %318 = vector.load %arg3[%c0_83, %c3_84, %c0_85, %c0_86] : memref<1x6x8x128xf32, #tpu.memory_space<vmem>>, vector<1x1x8x128xf32>
    %319 = vector.shape_cast %318 : vector<1x1x8x128xf32> to vector<8x128xf32>
    %320 = arith.addf %319, %299 : vector<8x128xf32>
    %c0_87 = arith.constant 0 : index
    %c3_88 = arith.constant 3 : index
    %c0_89 = arith.constant 0 : index
    %c0_90 = arith.constant 0 : index
    %321 = vector.load %arg3[%c0_87, %c3_88, %c0_89, %c0_90] : memref<1x6x8x128xf32, #tpu.memory_space<vmem>>, vector<1x1x8x128xf32>
    %322 = vector.shape_cast %321 : vector<1x1x8x128xf32> to vector<8x128xf32>
    %323 = vector.shape_cast %320 : vector<8x128xf32> to vector<1x1x8x128xf32>
    tpu.vector_store %arg3[%c0_87, %c3_88, %c0_89, %c0_90], %323 {strides = array<i32>} : memref<1x6x8x128xf32, #tpu.memory_space<vmem>>, vector<1x1x8x128xf32>,
    %c0_91 = arith.constant 0 : index
    %c4_92 = arith.constant 4 : index
    %c0_93 = arith.constant 0 : index
    %c0_94 = arith.constant 0 : index
    %324 = vector.load %arg3[%c0_91, %c4_92, %c0_93, %c0_94] : memref<1x6x8x128xf32, #tpu.memory_space<vmem>>, vector<1x1x8x128xf32>
    %325 = vector.shape_cast %324 : vector<1x1x8x128xf32> to vector<8x128xf32>
    %326 = arith.addf %325, %52 : vector<8x128xf32>
    %c0_95 = arith.constant 0 : index
    %c4_96 = arith.constant 4 : index
    %c0_97 = arith.constant 0 : index
    %c0_98 = arith.constant 0 : index
    %327 = vector.load %arg3[%c0_95, %c4_96, %c0_97, %c0_98] : memref<1x6x8x128xf32, #tpu.memory_space<vmem>>, vector<1x1x8x128xf32>
    %328 = vector.shape_cast %327 : vector<1x1x8x128xf32> to vector<8x128xf32>
    %329 = vector.shape_cast %326 : vector<8x128xf32> to vector<1x1x8x128xf32>
    tpu.vector_store %arg3[%c0_95, %c4_96, %c0_97, %c0_98], %329 {strides = array<i32>} : memref<1x6x8x128xf32, #tpu.memory_space<vmem>>, vector<1x1x8x128xf32>,
    %c0_99 = arith.constant 0 : index
    %c5_100 = arith.constant 5 : index
    %c0_101 = arith.constant 0 : index
    %c0_102 = arith.constant 0 : index
    %330 = vector.load %arg3[%c0_99, %c5_100, %c0_101, %c0_102] : memref<1x6x8x128xf32, #tpu.memory_space<vmem>>, vector<1x1x8x128xf32>
    %331 = vector.shape_cast %330 : vector<1x1x8x128xf32> to vector<8x128xf32>
    %332 = arith.addf %331, %53 : vector<8x128xf32>
    %c0_103 = arith.constant 0 : index
    %c5_104 = arith.constant 5 : index
    %c0_105 = arith.constant 0 : index
    %c0_106 = arith.constant 0 : index
    %333 = vector.load %arg3[%c0_103, %c5_104, %c0_105, %c0_106] : memref<1x6x8x128xf32, #tpu.memory_space<vmem>>, vector<1x1x8x128xf32>
    %334 = vector.shape_cast %333 : vector<1x1x8x128xf32> to vector<8x128xf32>
    %335 = vector.shape_cast %332 : vector<8x128xf32> to vector<1x1x8x128xf32>
    tpu.vector_store %arg3[%c0_103, %c5_104, %c0_105, %c0_106], %335 {strides = array<i32>} : memref<1x6x8x128xf32, #tpu.memory_space<vmem>>, vector<1x1x8x128xf32>,
    return
  }
  func.func @transform_0(%arg0: i32, %arg1: i32) -> (i32, i32, i32) {
    %c1_i32 = arith.constant 1 : i32
    %0 = arith.muli %arg0, %c1_i32 : i32
    %1 = arith.addi %0, %arg1 : i32
    %c0_i32 = arith.constant 0 : i32
    %c0_i32_0 = arith.constant 0 : i32
    %c0_i32_1 = arith.constant 0 : i32
    return %c0_i32, %1, %c0_i32_0 : i32, i32, i32
  }
  func.func @transform_1(%arg0: i32, %arg1: i32) -> (i32, i32, i32, i32) {
    %c0_i32 = arith.constant 0 : i32
    %c0_i32_0 = arith.constant 0 : i32
    %c0_i32_1 = arith.constant 0 : i32
    %c0_i32_2 = arith.constant 0 : i32
    return %arg0, %c0_i32, %c0_i32_0, %c0_i32_1 : i32, i32, i32, i32
  }
}

</mosaic_0001>

<bundles_post_ra>
// kernel: tpu_custom_call.1
= control target key start
LH: loop header
LB: loop body
LE: loop exit
PB: predicated region body
PF: predicated region fallthrough
CT: control target
= control target key end

     0   :  { %6 = vsyncpa [#allocation3], 0  ;;  %s1262_s0 = inlined_call_operand.hbm [shape: f32[26,16,128], index: 0, kind: input, shape index: {}]   ;;  %s1263_s1 = inlined_call_operand.hbm [shape: f32[2,6,8,128], index: 1, kind: output, shape index: {}]  }
   0x1   :  { %8 = vsyncpa [#allocation3 + $0x1], 0 }
   0x2   :  { %9 = vsyncpa [#allocation4], 0 }
   0x3   :  { %11 = vsyncpa [#allocation4 + $0x1], 0  ;;  %s878_s6 = smov 0   ;;  %s880_s7 = smov 0  }
   0x4   :  { %s882_s8 = smov 0   ;;  %s884_s9 = smov 0  }
   0x5   :  { %s886_s10 = smov 0   ;;  %s888_s11 = smov 0  }
   0x6 LB: > { %s601_s12 = sadd.s32 4294967295, %s858_s11   ;;  %s602_s13 = sadd.s32 4294967294, %s858_s11   ;;  %s858_s11 = sphi %s888_s11, %s17_s11   ;;  %s854_s10 = sphi %s886_s10, %s1279_s10   ;;  %s850_s9 = sphi %s884_s9, %s1278_s9   ;;  %s846_s8 = sphi %s882_s8, %s1277_s8   ;;  %s842_s7 = sphi %s880_s7, %s1276_s7   ;;  %s838_s6 = sphi %s878_s6, %s1275_s6  }
   0x7   : > { %s29_s14 = sadd.s32 1, %s854_s10  ;;  %s38_s15 = sadd.s32 1, %s846_s8 }
   0x8   : > { %p31_p0 = scmp.ge.s32.totalorder %s29_s14, 2  ;;  %p45_p1 = scmp.ne.s32.totalorder %s846_s8, %s842_s7 }
   0x9   : > { %p46_p2 = scmp.eq.s32.totalorder %s858_s11, 0  ;;  %p51_p3 = scmp.ne.s32.totalorder %s842_s7, %s838_s6 }
   0xa   : > { %s1281_s14 = smov (%p31_p0, %s29_s14), 0  ;;  %p52_p5 = scmp.eq.s32.totalorder %s601_s12, 0 }
   0xb   : > { %p919_p4 = por %p46_p2, %p45_p1  ;;  %s35_s17 = ssub.s32 %s854_s10, %s1281_s14 }
   0xc   : > { %p75_p6 = scmp.eq.s32.totalorder %s601_s12, 1  ;;  %p36_p7 = scmp.eq.s32.totalorder %s35_s17, 0 }
   0xd   : > { %p925_p8 = por %p52_p5, %p51_p3  ;;  %p81_p10 = scmp.eq.s32.totalorder %s602_s13, 1 }
   0xe   : > { %p929_p9 = por %p75_p6, %p45_p1  ;;  %p678_p13 = scmp.lt.s32.totalorder %s858_s11, 2 }
   0xf   : > { %s934_s20 = scalar_select %p36_p7, %s846_s8, %s38_s15  }
  0x10   : > { %s1267_s19 = scalar_select %p929_p9, 1, 0 }
  0x11   : > { %p936_p11 = por %p81_p10, %p51_p3  ;;  %s101_s22 = sand.u32 1, %s846_s8  }
  0x12   : > { %s662_s23 = smul.u32 208, %s101_s22  ;;  %s605_s24 = sshll.u32 %s854_s10, 7 }
  0x13   : > { %s1268_s21 = scalar_select %p936_p11, 1, 0 }
  0x14   : > { %p946_p0 = pnand %p678_p13, %p919_p4  ;;  %s953_s28 = scalar_lea.hbm %s1262_s0, %s605_s24 }
  0x15   : > { %s105_s29 = scalar_lea.vmem [#allocation2], %s662_s23  ;;  %s957_s2 = scalar_lea.sflag [#allocation3], %s101_s22 }
  0x16   : > { %s112_s30 = sshll.u32 %s105_s29, 4  ;;  %s746_s3 = scalar_lea.hbm %s953_s28, 3328  ;;  %s955_s30 = int_to_ptr.vmem [resolvable:$true] %s112_s30 }
  0x17   : > { %p747_p1 = scmp.ne.s32.totalorder %s953_s28, %s746_s3  ;;  %p748_p2 = pneg %p946_p0 }
  0x18   : > { %s751_s12 = scalar_lea.hbm %s1262_s0, 6656  ;;  %p752_p5 = scmp.lt.u32.totalorder %s953_s28, %s1262_s0 }
  0x19   : > { %p749_p3 = pnand %p748_p2, %p747_p1  ;;  %p753_p6 = scmp.lt.u32.totalorder %s751_s12, %s746_s3 }
  0x1a   : > { %p755_p10 = scmp.lt.u32.totalorder %s746_s3, %s953_s28 }
  0x1b   : > { %p750_p4 = pneg %p749_p3  ;;  %p754_p7 = por %p753_p6, %p752_p5 }
  0x1d   : > { %p756_p13 = por %p755_p10, %p754_p7 }
  0x1f   : > { %p757_p12 = pnand %p756_p13, %p750_p4 }
  0x21   : > { %760 = shalt.err (!%p757_p12)
}
  0x22   : > { %s761_s16 = scalar_lea.vmem %s955_s30, 3328  ;;  %s860_s17 = smov [#allocation2]  }
  0x23   : > { %p762_p1 = scmp.ne.s32.totalorder %s955_s30, %s761_s16  ;;  %s766_s22 = sshll.u32 %s860_s17, 4  ;;  %s767_s22 = int_to_ptr.vmem [resolvable:$false] %s766_s22 }
  0x24   : > { %s768_s23 = scalar_lea.vmem %s767_s22, 6656  ;;  %p769_p9 = scmp.lt.s32.totalorder %s955_s30, %s767_s22 }
  0x25   : > { %p764_p3 = pnand %p762_p1, %p748_p2  ;;  %p770_p5 = scmp.lt.s32.totalorder %s768_s23, %s761_s16 }
  0x27   : > { %p765_p11 = pneg %p764_p3  ;;  %p771_p6 = por %p770_p5, %p769_p9 }
  0x29   : > { %p772_p7 = pnand %p771_p6, %p765_p11 }
  0x2b   : > { %775 = shalt.err (!%p772_p7)
}
  0x2c   : > { %s861_s24 = smov 256   ;;  %s862_s26 = smov 128  }
  0x2d   : > { %s863_s27 = smov 8   ;;  %p606_p12 = scmp.ge.s32.totalorder %s858_s11, 1 }
  0x2e   : > { %673 = dma.hbm_to_vmem [thread:$0]  (!%p946_p0), %s953_s28, 3328, %s955_s30, %s957_s2, %s861_s24, %s862_s26, %s863_s27  }
  0x2f   : > { %p120_p2 = scmp.lt.s32.totalorder %s858_s11, 3 }
  0x31   : > { %p121_p4 = pnand %p606_p12, %p120_p2 }
  0x32   : > { %s988_s29 = sand.u32 (!%p121_p4), 1, %s842_s7  }
  0x33   : > { %124 = sbr.rel (%p121_p4) target bundleno = 135 (0x87), region = 24  ;;  %s127_s4 = scalar_lea.sflag (!%p121_p4), [#allocation3], %s988_s29 }
  0x34   : > { %s663_s3 = smul.u32 (!%p121_p4), 208, %s988_s29 }
  0x36   : > { %s992_s5 = scalar_lea.vmem (!%p121_p4), [#allocation2], %s663_s3 }
  0x3a   : > { %829 = dma.done.wait (%p925_p8), %s127_s4, 3328  }
  0x3b   : > { %831 = vsyncadd (%p925_p8), %s127_s4, 4294963968  ;;  %s664_s25 = smul.u32 48, %s988_s29  ;;  %v1000_v0 = vld [vmem:[%s992_s5 + $0xc0] sm:$0xff]  ;;  %v1003_v1 = vld [vmem:[%s992_s5 + $0x90] sm:$0xff]  ;;  %s481_s15 = scalar_lea.sflag [#allocation4], %s988_s29 }
  0x3c   : > { %v1006_v2 = vld [vmem:[%s992_s5 + $0x98] sm:$0xff]  ;;  %v1009_v3 = vld [vmem:[%s992_s5 + $0x30] sm:$0xff]  ;;  %v1012_v4 = vld [vmem:[%s992_s5 + $0x60] sm:$0xff]  ;;  %s665_s28 = smul.u32 768, %s850_s9  ;;  %p1272_p9 = scmp.ne.s32.totalorder %s1267_s19, 0 }
  0x3d   : > { %v209_v5 = vsub.f32 %v1009_v3, %v1003_v1  ;;  %v210_v6 = vsub.f32 %v1012_v4, %v1006_v2  ;;  %v1019_v7 = vld [vmem:[%s992_s5 + $0x38] sm:$0xff]  ;;  %v1022_v8 = vld [vmem:[%s992_s5 + $0x68] sm:$0xff]  ;;  %v1029_v11 = vld [vmem:[%s992_s5 + $0x40] sm:$0xff]  ;;  %s1034_s18 = scalar_lea.vmem [#allocation5], %s664_s25  ;;  %s865_s9 = smov [#allocation5]  }
  0x3e   : > { %v230_v9 = vsub.f32 %v1019_v7, %v1003_v1  ;;  %v231_v10 = vsub.f32 %v1022_v8, %v1006_v2  ;;  %v1032_v12 = vld [vmem:[%s992_s5 + $0x70] sm:$0xff]  ;;  %654 = vst [vmem:[%s1034_s18 + $0x18] sm:$0xff] %v1000_v0  ;;  %v256_v15 = vsub.f32 %v1029_v11, %v1003_v1  ;;  %v1043_v17 = vld [vmem:[%s992_s5 + $0x48] sm:$0xff]  ;;  %v1046_v18 = vld [vmem:[%s992_s5 + $0x78] sm:$0xff]  ;;  %s494_s30 = sshll.u32 %s1034_s18, 4  ;;  %s1210_s13 = scalar_lea.hbm %s1263_s1, %s665_s28  ;;  %s1212_s30 = int_to_ptr.vmem [resolvable:$true] %s494_s30 }
  0x3f   : > { %v211_v13 = vmul.f32 %v209_v5, %v209_v5  ;;  %v212_v14 = vmul.f32 %v210_v6, %v210_v6  ;;  %v257_v16 = vsub.f32 %v1032_v12, %v1006_v2  ;;  %v282_v21 = vsub.f32 %v1043_v17, %v1003_v1  ;;  %v1053_v23 = vld [vmem:[%s992_s5 + $0x50] sm:$0xff]  ;;  %v1056_v24 = vld [vmem:[%s992_s5 + $0x80] sm:$0xff]  ;;  %v1067_v33 = vld [vmem:[%s992_s5 + $0x58] sm:$0xff]  ;;  %s776_s16 = scalar_lea.vmem %s1212_s30, 768  ;;  %s780_s17 = sshll.u32 %s865_s9, 4  ;;  %s781_s17 = int_to_ptr.vmem [resolvable:$false] %s780_s17 }
  0x40   : > { %v232_v19 = vmul.f32 %v230_v9, %v230_v9  ;;  %v233_v20 = vmul.f32 %v231_v10, %v231_v10  ;;  %v283_v22 = vsub.f32 %v1046_v18, %v1006_v2  ;;  %v258_v26 = vmul.f32 %v256_v15, %v256_v15  ;;  %v1070_v34 = vld [vmem:[%s992_s5 + $0x88] sm:$0xff]  ;;  %v611_v35 = vld [vmem:[%s992_s5 + $0xa0] sm:$0xff]  ;;  %v613_v37 = vld [vmem:[%s992_s5 + $0xb0] sm:$0xff]  ;;  %p777_p8 = scmp.ne.s32.totalorder %s1212_s30, %s776_s16  ;;  %s782_s22 = scalar_lea.vmem %s781_s17, 1536 }
  0x41   : > { %v1058_v25 = vadd.f32 %v212_v14, %v211_v13  ;;  %v259_v27 = vmul.f32 %v257_v16, %v257_v16  ;;  %v308_v28 = vsub.f32 %v1053_v23, %v1003_v1  ;;  %v284_v30 = vmul.f32 %v282_v21, %v282_v21  ;;  %v612_v36 = vld [vmem:[%s992_s5 + $0xa8] sm:$0xff]  ;;  %v614_v38 = vld [vmem:[%s992_s5 + $0xb8] sm:$0xff]  ;;  %p783_p10 = scmp.lt.s32.totalorder %s1212_s30, %s781_s17  ;;  %p784_p13 = scmp.lt.s32.totalorder %s782_s22, %s776_s16 }
  0x42   : > { %v1062_v29 = vadd.f32 %v233_v20, %v232_v19  ;;  %v285_v31 = vmul.f32 %v283_v22, %v283_v22  ;;  %v309_v32 = vsub.f32 %v1056_v24, %v1006_v2  ;;  %v334_v43 = vsub.f32 %v1067_v33, %v1003_v1  ;;  %v608_v50 = vld [vmem:[%s992_s5 + $0xc8] sm:$0xff]  ;;  %v208_v20 = vld [vmem:[%s992_s5] sm:$0xff]  ;;  %p778_p11 = pnand %p777_p8, %p1272_p9 }
  0x43   : > { %734 = vrsqrt.f32 %v1058_v25  ;;  %v1078_v39 = vadd.f32 %v259_v27, %v258_v26  ;;  %v310_v41 = vmul.f32 %v308_v28, %v308_v28  ;;  %v335_v44 = vsub.f32 %v1070_v34, %v1006_v2  ;;  %658 = vst [vmem:[%s1034_s18 + $0x28] sm:$0xff] %v608_v50  ;;  %v621_v22 = vld [vmem:[%s992_s5 + $0x8] sm:$0xff]  ;;  %p785_p1 = por %p784_p13, %p783_p10 }
  0x44   : > { %736 = vrsqrt.f32 %v1062_v29  ;;  %v1080_v40 = vadd.f32 %v285_v31, %v284_v30  ;;  %v311_v42 = vmul.f32 %v309_v32, %v309_v32  ;;  %v184_v45 = vsub.f32 %v613_v37, %v611_v35  ;;  %v624_v37 = vld [vmem:[%s992_s5 + $0x10] sm:$0xff]  ;;  %p779_p0 = pneg %p778_p11 }
  0x45   : > { %v191_v46 = vsub.f32 %v614_v38, %v612_v36  ;;  %738 = vrsqrt.f32 %v1078_v39  ;;  %vm216_vm0 = vcmp.eq.f32.partialorder %v1058_v25, inf  ;;  %v336_v48 = vmul.f32 %v334_v43, %v334_v43 }
  0x46   : > { %740 = vrsqrt.f32 %v1080_v40  ;;  %v1089_v47 = vadd.f32 %v311_v42, %v310_v41  ;;  %v337_v49 = vmul.f32 %v335_v44, %v335_v44  ;;  %v185_v51 = vand.u32 2147483647, %v184_v45  ;;  %p786_p3 = pnand %p785_p1, %p779_p0 }
  0x47   : > { %v187_v52 = vmul.f32 0.5, %v184_v45  ;;  %v192_v53 = vand.u32 2147483647, %v191_v46  ;;  %v194_v54 = vmul.f32 0.5, %v191_v46  ;;  %vm218_vm1 = vcmp.eq.f32.partialorder %v1058_v25, 0.0 }
  0x48   : > { %v219_v55 = vand.u32 2147483648, %v1058_v25  ;;  %vm237_vm2 = vcmp.eq.f32.partialorder %v1062_v29, inf  ;;  %742 = vrsqrt.f32 %v1089_v47  ;;  %v1096_v56 = vadd.f32 %v337_v49, %v336_v48 }
  0x49   : > { %vm1098_vm3 = vcmp.lt.f32.partialorder %v185_v51, 1.0  ;;  %v188_v58 = vmul.f32 %v187_v52, %v184_v45  ;;  %v615_v59 = vadd.f32 -0.5, %v185_v51  ;;  %vm239_vm4 = vcmp.eq.f32.partialorder %v1062_v29, 0.0 }
  0x4a   : > { %vm193_vm5 = vcmp.lt.f32.partialorder %v192_v53, 1.0  ;;  %v195_v61 = vmul.f32 %v194_v54, %v191_v46  ;;  %v616_v62 = vadd.f32 -0.5, %v192_v53  ;;  %v240_v6 = vand.u32 2147483648, %v1062_v29  ;;  %v627_v46 = vld [vmem:[%s992_s5 + $0x18] sm:$0xff] }
  0x4b   : > { %vm263_vm6 = vcmp.eq.f32.partialorder %v1078_v39, inf  ;;  %744 = vrsqrt.f32 %v1096_v56  ;;  %vm265_vm7 = vcmp.eq.f32.partialorder %v1078_v39, 0.0  ;;  %v190_v10 = vsel %vm1098_vm3, %v188_v58, %v615_v59  ;;  %v633_v59 = vld [vmem:[%s992_s5 + $0x28] sm:$0xff] }
  0x4c   : > { %v197_v13 = vsel %vm193_vm5, %v195_v61, %v616_v62  ;;  %v266_v15 = vand.u32 2147483648, %v1078_v39  ;;  %vm289_vm8 = vcmp.eq.f32.partialorder %v1080_v40, inf  ;;  %vm291_vm9 = vcmp.eq.f32.partialorder %v1080_v40, 0.0 }
  0x4d   : > { %v735_v60 = vpop.eup %734  ;;  %v198_v16 = vadd.f32 %v197_v13, %v190_v10  ;;  %v292_v27 = vand.u32 2147483648, %v1080_v40  ;;  %vm315_vm10 = vcmp.eq.f32.partialorder %v1089_v47, inf  ;;  %vm317_vm12 = vcmp.eq.f32.partialorder %v1089_v47, 0.0 }
  0x4e   : > { %v737_v63 = vpop.eup %736  ;;  %v215_v5 = vmul.f32 %v735_v60, %v1058_v25  ;;  %v318_v35 = vand.u32 2147483648, %v1089_v47  ;;  %vm341_vm14 = vcmp.eq.f32.partialorder %v1096_v56, inf }
  0x4f   : > { %v236_v9 = vmul.f32 %v737_v63, %v1062_v29  ;;  %v739_v19 = vpop.eup %738 }
  0x50   : > { %v217_v14 = vsel %vm216_vm0, %v1058_v25, %v215_v5  ;;  %v741_v28 = vpop.eup %740  ;;  %v262_v31 = vmul.f32 %v739_v19, %v1078_v39  ;;  %v199_v25 = vmul.f32 %v608_v50, %v198_v16  ;;  %vm343_vm0 = vcmp.eq.f32.partialorder %v1096_v56, 0.0 }
  0x51   : > { %v1120_v21 = vsel %vm218_vm1, %v219_v55, %v217_v14  ;;  %v238_v26 = vsel %vm237_vm2, %v1062_v29, %v236_v9  ;;  %v288_v32 = vmul.f32 %v741_v28, %v1080_v40  ;;  %v864_v9 = vmov 0.0  }
  0x52   : > { %v1130_v30 = vsel %vm239_vm4, %v240_v6, %v238_v26  ;;  %v264_v38 = vsel %vm263_vm6, %v1078_v39, %v262_v31  ;;  %v743_v42 = vpop.eup %742  ;;  %656 = vst [vmem:[%s1034_s18 + $0x20] sm:$0xff] %v199_v25 }
  0x53   : > { %vm242_vm11 = vcmp.lt.f32.partialorder %v1130_v30, %v1120_v21  ;;  %v267_v43 = vsel %vm265_vm7, %v266_v15, %v264_v38  ;;  %v290_v44 = vsel %vm289_vm8, %v1080_v40, %v288_v32  ;;  %v344_v40 = vand.u32 2147483648, %v1096_v56 }
  0x54   : > { %v243_v29 = vsel %vm242_vm11, %v1130_v30, %v1120_v21  ;;  %v244_v36 = vsel %vm242_vm11, %v621_v22, %v208_v20  ;;  %v245_v41 = vsel %vm242_vm11, %v1019_v7, %v1009_v3  ;;  %v246_v45 = vsel %vm242_vm11, %v1022_v8, %v1012_v4  ;;  %v630_v4 = vld [vmem:[%s992_s5 + $0x20] sm:$0xff] }
  0x55   : > { %vm268_vm13 = vcmp.lt.f32.partialorder %v267_v43, %v243_v29  ;;  %v1157_v48 = vsel %vm291_vm9, %v292_v27, %v290_v44  ;;  %v314_v3 = vmul.f32 %v743_v42, %v1089_v47  ;;  %v745_v51 = vpop.eup %744 }
  0x56   : > { %v269_v7 = vsel %vm268_vm13, %v267_v43, %v243_v29  ;;  %v270_v39 = vsel %vm268_vm13, %v624_v37, %v244_v36  ;;  %v271_v49 = vsel %vm268_vm13, %v1029_v11, %v245_v41  ;;  %v272_v50 = vsel %vm268_vm13, %v1032_v12, %v246_v45 }
  0x57   : > { %vm294_vm15 = vcmp.lt.f32.partialorder %v1157_v48, %v269_v7  ;;  %v316_v8 = vsel %vm315_vm10, %v1089_v47, %v314_v3  ;;  %v340_v12 = vmul.f32 %v745_v51, %v1096_v56 }
  0x58   : > { %v295_v52 = vsel %vm294_vm15, %v1157_v48, %v269_v7  ;;  %v296_v53 = vsel %vm294_vm15, %v627_v46, %v270_v39  ;;  %v319_v11 = vsel %vm317_vm12, %v318_v35, %v316_v8  ;;  %v297_v54 = vsel %vm294_vm15, %v1043_v17, %v271_v49 }
  0x59   : > { %vm320_vm1 = vcmp.lt.f32.partialorder %v319_v11, %v295_v52  ;;  %v298_v55 = vsel %vm294_vm15, %v1046_v18, %v272_v50  ;;  %v342_v60 = vsel %vm341_vm14, %v1096_v56, %v340_v12 }
  0x5a   : > { %v321_v57 = vsel %vm320_vm1, %v319_v11, %v295_v52  ;;  %v322_v58 = vsel %vm320_vm1, %v630_v4, %v296_v53  ;;  %v323_v61 = vsel %vm320_vm1, %v1053_v23, %v297_v54  ;;  %v1182_v62 = vsel %vm343_vm0, %v344_v40, %v342_v60 }
  0x5b   : > { %v324_v47 = vsel %vm320_vm1, %v1056_v24, %v298_v55  ;;  %vm346_vm2 = vcmp.lt.f32.partialorder %v1182_v62, %v321_v57 }
  0x5c   : > { %v347_v63 = vsel %vm346_vm2, %v1182_v62, %v321_v57  ;;  %v348_v17 = vsel %vm346_vm2, %v633_v59, %v322_v58  ;;  %v1188_v18 = vsel %vm346_vm2, %v1067_v33, %v323_v61  ;;  %v1191_v5 = vsel %vm346_vm2, %v1070_v34, %v324_v47 }
  0x5d   : > { %vm351_vm3 = vcmp.lt.f32.partialorder %v347_v63, 2.0  ;;  %v355_v6 = vsub.f32 %v348_v17, %v208_v20  ;;  %v356_v56 = vsub.f32 %v1120_v21, %v347_v63  ;;  %v369_v23 = vsub.f32 %v348_v17, %v621_v22 }
  0x5e   : > { %v634_v10 = vsel %vm351_vm3, 1.0, %v864_v9  ;;  %v370_v24 = vsub.f32 %v1130_v30, %v347_v63  ;;  %v383_v13 = vsub.f32 %v348_v17, %v624_v37  ;;  %v384_v14 = vsub.f32 %v267_v43, %v347_v63 }
  0x5f   : > { %v354_v15 = vmul.f32 %v634_v10, %v1000_v0  ;;  %vm357_vm4 = vcmp.gt.f32.partialorder %v356_v56, 0.2  ;;  %vm361_vm5 = vcmp.lt.f32.partialorder %v355_v6, 0.2  ;;  %v366_v33 = vsub.f32 0.2, %v355_v6 }
  0x60   : > { %v635_v16 = vsel %vm357_vm4, 1.0, %v864_v9  ;;  %v636_v19 = vsel %vm361_vm5, 1.0, %v864_v9  ;;  %vm371_vm6 = vcmp.gt.f32.partialorder %v370_v24, 0.2  ;;  %vm375_vm7 = vcmp.lt.f32.partialorder %v369_v23, 0.2 }
  0x61   : > { %v360_v34 = vmul.f32 %v635_v16, %v354_v15  ;;  %v637_v20 = vsel %vm371_vm6, 1.0, %v864_v9  ;;  %v638_v26 = vsel %vm375_vm7, 1.0, %v864_v9  ;;  %v380_v21 = vsub.f32 0.2, %v369_v23 }
  0x62   : > { %v374_v22 = vmul.f32 %v637_v20, %v354_v15  ;;  %vm385_vm8 = vcmp.gt.f32.partialorder %v384_v14, 0.2  ;;  %vm389_vm9 = vcmp.lt.f32.partialorder %v383_v13, 0.2  ;;  %v394_v27 = vsub.f32 0.2, %v383_v13 }
  0x63   : > { %v364_v28 = vmul.f32 %v636_v19, %v360_v34  ;;  %v639_v30 = vsel %vm385_vm8, 1.0, %v864_v9  ;;  %v640_v31 = vsel %vm389_vm9, 1.0, %v864_v9  ;;  %v397_v25 = vsub.f32 %v348_v17, %v627_v46 }
  0x64   : > { %v378_v32 = vmul.f32 %v638_v26, %v374_v22  ;;  %v388_v35 = vmul.f32 %v639_v30, %v354_v15  ;;  %v398_v29 = vsub.f32 %v1157_v48, %v347_v63  ;;  %v411_v36 = vsub.f32 %v348_v17, %v630_v4 }
  0x65   : > { %v367_v37 = vmul.f32 %v366_v33, %v364_v28  ;;  %vm403_vm10 = vcmp.lt.f32.partialorder %v397_v25, 0.2  ;;  %v408_v38 = vsub.f32 0.2, %v397_v25  ;;  %v412_v41 = vsub.f32 %v319_v11, %v347_v63 }
  0x66   : > { %v381_v42 = vmul.f32 %v380_v21, %v378_v32  ;;  %v392_v43 = vmul.f32 %v640_v31, %v388_v35  ;;  %vm399_vm11 = vcmp.gt.f32.partialorder %v398_v29, 0.2  ;;  %v642_v44 = vsel %vm403_vm10, 1.0, %v864_v9 }
  0x67   : > { %v641_v45 = vsel %vm399_vm11, 1.0, %v864_v9  ;;  %vm413_vm12 = vcmp.gt.f32.partialorder %v412_v41, 0.2  ;;  %vm417_vm13 = vcmp.lt.f32.partialorder %v411_v36, 0.2  ;;  %v425_v3 = vsub.f32 %v348_v17, %v633_v59 }
  0x68   : > { %v382_v7 = vadd.f32 %v381_v42, %v367_v37  ;;  %v395_v39 = vmul.f32 %v394_v27, %v392_v43  ;;  %v402_v46 = vmul.f32 %v641_v45, %v354_v15  ;;  %v643_v49 = vsel %vm413_vm12, 1.0, %v864_v9 }
  0x69   : > { %v416_v50 = vmul.f32 %v643_v49, %v354_v15  ;;  %v644_v51 = vsel %vm417_vm13, 1.0, %v864_v9  ;;  %v422_v48 = vsub.f32 0.2, %v411_v36  ;;  %v426_v4 = vsub.f32 %v1182_v62, %v347_v63 }
  0x6a   : > { %v396_v8 = vadd.f32 %v395_v39, %v382_v7  ;;  %v406_v40 = vmul.f32 %v642_v44, %v402_v46  ;;  %vm431_vm14 = vcmp.lt.f32.partialorder %v425_v3, 0.2  ;;  %v379_v11 = vadd.f32 %v378_v32, %v364_v28 }
  0x6b   : > { %v420_v52 = vmul.f32 %v644_v51, %v416_v50  ;;  %vm427_vm15 = vcmp.gt.f32.partialorder %v426_v4, 0.2  ;;  %v646_v53 = vsel %vm431_vm14, 1.0, %v864_v9  ;;  %v439_v55 = vsub.f32 %v1188_v18, %v1003_v1 }
  0x6c   : > { %v409_v12 = vmul.f32 %v408_v38, %v406_v40  ;;  %v645_v54 = vsel %vm427_vm15, 1.0, %v864_v9  ;;  %v446_v57 = vsub.f32 %v1191_v5, %v1006_v2  ;;  %v436_v60 = vsub.f32 0.2, %v425_v3 }
  0x6d   : > { %v423_v58 = vmul.f32 %v422_v48, %v420_v52  ;;  %v430_v59 = vmul.f32 %v645_v54, %v354_v15  ;;  %v393_v61 = vadd.f32 %v392_v43, %v379_v11  ;;  %v440_v47 = vand.u32 2147483647, %v439_v55 }
  0x6e   : > { %v410_v62 = vadd.f32 %v409_v12, %v396_v8  ;;  %v442_v63 = vmul.f32 0.5, %v439_v55  ;;  %v447_v17 = vand.u32 2147483647, %v446_v57  ;;  %v449_v23 = vmul.f32 0.5, %v446_v57 }
  0x6f   : > { %v434_v6 = vmul.f32 %v646_v53, %v430_v59  ;;  %v407_v56 = vadd.f32 %v406_v40, %v393_v61  ;;  %vm441_vm0 = vcmp.lt.f32.partialorder %v440_v47, 1.0  ;;  %v647_v18 = vadd.f32 -0.5, %v440_v47 }
  0x70   : > { %v424_v9 = vadd.f32 %v423_v58, %v410_v62  ;;  %v443_v1 = vmul.f32 %v442_v63, %v439_v55  ;;  %vm448_vm1 = vcmp.lt.f32.partialorder %v447_v17, 1.0  ;;  %v450_v10 = vmul.f32 %v449_v23, %v446_v57 }
  0x71   : > { %v437_v2 = vmul.f32 %v436_v60, %v434_v6  ;;  %v421_v5 = vadd.f32 %v420_v52, %v407_v56  ;;  %v648_v13 = vadd.f32 -0.5, %v447_v17 }
  0x72   : > { %v445_v24 = vsel %vm441_vm0, %v443_v1, %v647_v18 }
  0x73   : > { %v438_v14 = vadd.f32 %v437_v2, %v424_v9  ;;  %v435_v15 = vadd.f32 %v434_v6, %v421_v5  ;;  %v452_v33 = vsel %vm448_vm1, %v450_v10, %v648_v13 }
  0x74   : > { %v453_v16 = vadd.f32 %v452_v33, %v445_v24 }
  0x75   : > { %459 = vst [vmem:[%s1034_s18] sm:$0xff] %v438_v14  ;;  %650 = vst [vmem:[%s1034_s18 + $0x8] sm:$0xff] %v435_v15 }
  0x76   : > { %v454_v19 = vmul.f32 %v1000_v0, %v453_v16 }
  0x78   : > { %652 = vst [vmem:[%s1034_s18 + $0x10] sm:$0xff] %v454_v19 }
  0x79   : > { %789 = shalt.err (!%p786_p3)
}
  0x7a   : > { %s790_s23 = scalar_lea.hbm %s1210_s13, 768  ;;  %s794_s27 = scalar_lea.hbm %s1263_s1, 1536 }
  0x7b   : > { %p791_p5 = scmp.ne.s32.totalorder %s1210_s13, %s790_s23  ;;  %p795_p12 = scmp.lt.u32.totalorder %s1210_s13, %s1263_s1 }
  0x7c   : > { %p796_p2 = scmp.lt.u32.totalorder %s794_s27, %s790_s23  ;;  %p798_p8 = scmp.lt.u32.totalorder %s790_s23, %s1210_s13 }
  0x7d   : > { %p792_p6 = pnand %p791_p5, %p1272_p9 }
  0x7e   : > { %p797_p4 = por %p796_p2, %p795_p12 }
  0x7f   : > { %p793_p7 = pneg %p792_p6 }
  0x80   : > { %p799_p11 = por %p798_p8, %p797_p4 }
  0x82   : > { %p800_p0 = pnand %p799_p11, %p793_p7 }
  0x84   : > { %803 = shalt.err (!%p800_p0)
}
  0x85   : > { %s866_s5 = smov 128   ;;  %s867_s25 = smov 8  }
  0x86   : > { %668 = dma.vmem_to_hbm [thread:$0]  (%p1272_p9), %s1212_s30, 768, %s1210_s13, %s481_s15, %s866_s5, %s866_s5, %s867_s25  }
  0x87 PF: > { %s509_s18 = sand.u32 1, %s838_s6   ;;  %p1273_p10 = scmp.ne.s32.totalorder %s1268_s21, 0 }
  0x88   : > { %p1274_p13 = scmp.ge.s32.totalorder %s858_s11, 2  ;;  %s510_s28 = scalar_lea.sflag [#allocation4], %s509_s18 }
  0x8a   : > { %p675_p1 = pnand %p1274_p13, %p1273_p10 }
  0x8c   : > { %833 = dma.done.wait (!%p675_p1), %s510_s28, 768  }
  0x8d   : > { %835 = vsyncadd (!%p675_p1), %s510_s28, 4294966528  ;;  %s17_s11 = sadd.s32 1, %s858_s11   ;;  %s1275_s6 = smov %s842_s7 }
  0x8e   : > { %p14_p3 = scmp.ge.s32.totalorder %s17_s11, 4   ;;  %s1276_s7 = smov %s846_s8 }
  0x8f   : > { %s1277_s8 = smov %s934_s20  ;;  %s1278_s9 = smov %s854_s10 }
  0x90   : > { %s1279_s10 = smov %s1281_s14  ;;  %16 = sbr.rel (!%p14_p3) target bundleno = 6 (0x6), region = 103 }
  0x97   :  { %515 = vsyncpa [#allocation3], 1 }
  0x98   :  { %517 = vsyncpa [#allocation3 + $0x1], 1 }
  0x99   :  { %518 = vsyncpa [#allocation4], 1 }
  0x9a   :  { %520 = vsyncpa [#allocation4 + $0x1], 1 }

</bundles_post_ra>
